<compile_context>
chip_gen: v5e
topology: v5e:2x2
jax: 0.10.0
libtpu: 0.0.40
codegen_flags: <defaults>
</compile_context>

<pallas_src>
import functools

import jax
import jax.numpy as jnp
from jax.experimental import pallas as pl
from jax.experimental.pallas import tpu as pltpu

_LANE = 128
_SUBLANE = 8
_TM_MAX = 1024   # ~86% of HBM roofline at 1024; bigger tiles only add single-digit %.


def _round_up(x, m):
    return (x + m - 1) // m * m


def _vmem_capacity_bytes():
    try:
        return int(pltpu.get_tpu_info().vmem_capacity_bytes)
    except Exception:
        return 64 * 1024 * 1024  # conservative: v7x per-TensorCore VMEM


def _plan(C, n, n_streams, in_itemsize):
    """Pick sublane tile (tm) and padded row count for the flattened (C, m, 128) layout."""
    m = pl.cdiv(n, _LANE)
    vmem_cap = _vmem_capacity_bytes()
    budget = max(8 << 20, int(vmem_cap * 0.6))  # headroom under physical VMEM
    # Double-buffered bytes per sublane-row of one grid step:
    per_row = 2 * (n_streams * C * _LANE * in_itemsize + 2 * _LANE * 4)
    tm_cap = min(_TM_MAX, max(_SUBLANE, budget // per_row))
    if m <= tm_cap:
        tm, m_pad = m, m                         # single block == full array dims
    else:
        tm_cap8 = max(_SUBLANE, (tm_cap // _SUBLANE) * _SUBLANE)
        tm = tm_cap8
        for t in range(tm_cap8, _SUBLANE - 1, -_SUBLANE):
            if m % t == 0:                       # prefer a divisor of m: zero padding
                tm = t
                break
        m_pad = _round_up(m, tm)
    vmem_limit = int(min(int(vmem_cap * 0.85), max(int(1.5 * per_row * tm), 32 << 20)))
    return m, tm, m_pad, vmem_limit


def _to_kernel_layout(x, C, n, m_pad, dtype):
    """(1, C, R, S, D) -> (C, m_pad, 128); pads only when the flat length demands it."""
    flat = x.reshape(C, n).astype(dtype)
    tgt = m_pad * _LANE
    if tgt != n:
        flat = jnp.pad(flat, ((0, 0), (0, tgt - n)))
    return flat.reshape(C, m_pad, _LANE)


def _from_kernel_layout(y, n, out_shape):
    flat = y.reshape(-1)
    if flat.shape[0] != n:
        flat = flat[:n]
    return flat.reshape(out_shape)


# ---------------------------------------------------------------------------- kernels

def _kernel_full(au_ref, pu_ref, ae_ref, pe_ref, ou_ref, oe_ref):
    """out = sum_c A[c] * P[c] for both branches; explicit unroll over C, f32 accumulate."""
    C = au_ref.shape[0]
    f32 = jnp.float32
    acc_u = au_ref[0].astype(f32) * pu_ref[0].astype(f32)
    acc_e = ae_ref[0].astype(f32) * pe_ref[0].astype(f32)
    for c in range(1, C):
        acc_u = acc_u + au_ref[c].astype(f32) * pu_ref[c].astype(f32)
        acc_e = acc_e + ae_ref[c].astype(f32) * pe_ref[c].astype(f32)
    ou_ref[...] = acc_u
    oe_ref[...] = acc_e


def _kernel_uniform(au_ref, ae_ref, ou_ref, oe_ref, *, scale_user, scale_event):
    """Uniform-softmax fast path: P == 1/C everywhere, so P never touches HBM."""
    C = au_ref.shape[0]
    f32 = jnp.float32
    acc_u = au_ref[0].astype(f32)
    acc_e = ae_ref[0].astype(f32)
    for c in range(1, C):
        acc_u = acc_u + au_ref[c].astype(f32)
        acc_e = acc_e + ae_ref[c].astype(f32)
    ou_ref[...] = acc_u * jnp.float32(scale_user)
    oe_ref[...] = acc_e * jnp.float32(scale_event)


def _fused_pallas_call(kernel, inputs, C, m_pad, tm, vmem_limit):
    in_spec = pl.BlockSpec((C, tm, _LANE), lambda i: (0, i, 0))
    out_spec = pl.BlockSpec((tm, _LANE), lambda i: (i, 0))
    return pl.pallas_call(
        kernel,
        out_shape=(jax.ShapeDtypeStruct((m_pad, _LANE), jnp.float32),
                   jax.ShapeDtypeStruct((m_pad, _LANE), jnp.float32)),
        grid_spec=pl.GridSpec(
            grid=(m_pad // tm,),
            in_specs=[in_spec] * len(inputs),
            out_specs=(out_spec, out_spec),
        ),
        compiler_params=pltpu.CompilerParams(
            # TODO(synk): on v7x, pltpu.CORE_PARALLEL (or core_map) could force both
            # TensorCores to stream DMAs; "parallel" is kept for portability.
            dimension_semantics=("parallel",),
            vmem_limit_bytes=int(vmem_limit)),
    )(*inputs)


# ---------------------------------------------------------------------------- forwards

def _forward_full(a_user, a_event, p_user_l, p_event_l, *,
                  tm, m_pad, vmem_limit, storage_dtype):
    O, C, U, I, D = a_user.shape
    assert O == 1, "GTConv Pallas port requires out_channels == 1"
    assert a_event.shape == (O, C, I, U, D)
    n = U * I * D
    au = _to_kernel_layout(a_user, C, n, m_pad, storage_dtype)
    ae = _to_kernel_layout(a_event, C, n, m_pad, storage_dtype)
    ou, oe = _fused_pallas_call(_kernel_full, (au, p_user_l, ae, p_event_l),
                                C, m_pad, tm, vmem_limit)
    return (_from_kernel_layout(ou, n, (U, I, D)),
            _from_kernel_layout(oe, n, (I, U, D)))


def _forward_uniform(a_user, a_event, *, scale_user, scale_event,
                     tm, m_pad, vmem_limit, storage_dtype):
    O, C, U, I, D = a_user.shape
    assert O == 1, "GTConv Pallas port requires out_channels == 1"
    assert a_event.shape == (O, C, I, U, D)
    n = U * I * D
    au = _to_kernel_layout(a_user, C, n, m_pad, storage_dtype)
    ae = _to_kernel_layout(a_event, C, n, m_pad, storage_dtype)
    kernel = functools.partial(_kernel_uniform,
                               scale_user=scale_user, scale_event=scale_event)
    ou, oe = _fused_pallas_call(kernel, (au, ae), C, m_pad, tm, vmem_limit)
    return (_from_kernel_layout(ou, n, (U, I, D)),
            _from_kernel_layout(oe, n, (I, U, D)))


def _is_channel_uniform(w):
    """softmax(w, axis=1) == 1/C everywhere iff w is constant along the channel axis."""
    return bool(jnp.all(w == w[:, :1]))


# ---------------------------------------------------------------------------- module

class GTLayerPallas:
    """JAX/Pallas port of GTLayer.  Weights initialized as in GTConv.reset_parameters
    (constant 0.1, bias=None, scale=0.1 unused in forward).

    storage_dtype=jnp.bfloat16 halves kernel HBM traffic (f32 accumulation kept) but
    deviates slightly from the f32 reference; default float32 matches it."""

    def __init__(self, in_channels, out_channels, num_dim, num_user, num_item,
                 storage_dtype=jnp.float32):
        assert out_channels == 1, "GTConv Pallas port requires out_channels == 1"
        self.in_channels = in_channels
        self.out_channels = out_channels
        self.num_dim = num_dim
        self.num_user = num_user
        self.num_item = num_item
        self.storage_dtype = jnp.dtype(storage_dtype)
        self.w_user = jnp.full(
            (out_channels, in_channels, num_user, num_item, num_dim), 0.1, jnp.float32)
        self.w_event = jnp.full(
            (out_channels, in_channels, num_item, num_user, num_dim), 0.1, jnp.float32)
        self._rebuild()

    def set_weights(self, w_user, w_event):
        assert w_user.shape == self.w_user.shape
        assert w_event.shape == self.w_event.shape
        self.w_user = jnp.asarray(w_user, jnp.float32)
        self.w_event = jnp.asarray(w_event, jnp.float32)
        self._rebuild()

    def _rebuild(self):
        C = self.in_channels
        n = self.num_user * self.num_item * self.num_dim
        itemsize = self.storage_dtype.itemsize
        # Fixed (inference) parameters: derive softmax(weight, dim=1) ONCE here.
        p_user = jax.nn.softmax(self.w_user, axis=1)
        p_event = jax.nn.softmax(self.w_event, axis=1)
        self._uniform = (_is_channel_uniform(self.w_user)
                         and _is_channel_uniform(self.w_event))
        if self._uniform:
            # softmax of channel-constant weights is exactly 1/C: pass it as a baked
            # scalar, never reading a C*U*I*D P tensor from HBM.
            _, tm, m_pad, vmem_limit = _plan(C, n, n_streams=2, in_itemsize=itemsize)
            scale_user = float(p_user.reshape(-1)[0])
            scale_event = float(p_event.reshape(-1)[0])
            self._forward = jax.jit(functools.partial(
                _forward_uniform, scale_user=scale_user, scale_event=scale_event,
                tm=tm, m_pad=m_pad, vmem_limit=vmem_limit,
                storage_dtype=self.storage_dtype))
            self._p_user_l = self._p_event_l = None
        else:
            _, tm, m_pad, vmem_limit = _plan(C, n, n_streams=4, in_itemsize=itemsize)
            # Pre-flatten / pre-cast P ONCE into the kernel layout (no per-call work).
            self._p_user_l = _to_kernel_layout(p_user, C, n, m_pad, self.storage_dtype)
            self._p_event_l = _to_kernel_layout(p_event, C, n, m_pad, self.storage_dtype)
            self._forward = jax.jit(functools.partial(
                _forward_full, tm=tm, m_pad=m_pad, vmem_limit=vmem_limit,
                storage_dtype=self.storage_dtype))

    def __call__(self, A_user, A_event):
        if self._uniform:
            return self._forward(A_user, A_event)
        return self._forward(A_user, A_event, self._p_user_l, self._p_event_l)


def _reference(A, W):
    """Pure-JAX reference mirroring the PyTorch GTConv.forward exactly."""
    p = jax.nn.softmax(W, axis=1)
    return jnp.sum(jnp.squeeze(A * p, axis=0), axis=0)


if __name__ == "__main__":
    in_channels, out_channels = 2, 1
    num_user, num_item, num_dim = 8, 16, 4

    key = jax.random.PRNGKey(0)
    k1, k2, k3, k4 = jax.random.split(key, 4)
    A_user = jax.random.normal(
        k1, (out_channels, in_channels, num_user, num_item, num_dim), jnp.float32)
    A_event = jax.random.normal(
        k2, (out_channels, in_channels, num_item, num_user, num_dim), jnp.float32)

    # 1) Default constant-0.1 weights (GTConv.reset_parameters) -> uniform fast path.
    layer = GTLayerPallas(in_channels, out_channels, num_dim, num_user, num_item)
    out_user, out_event = layer(A_user, A_event)
    jax.block_until_ready((out_user, out_event))
    ref_user = _reference(A_user, layer.w_user)
    ref_event = _reference(A_event, layer.w_event)
    assert out_user.shape == (num_user, num_item, num_dim)
    assert out_event.shape == (num_item, num_user, num_dim)
    assert jnp.allclose(out_user, ref_user, atol=1e-5, rtol=1e-5)
    assert jnp.allclose(out_event, ref_event, atol=1e-5, rtol=1e-5)

    # 2) Non-uniform weights -> full multiply-reduce path with pre-laid-out softmax(weight).
    w_user = jax.random.normal(k3, layer.w_user.shape, jnp.float32)
    w_event = jax.random.normal(k4, layer.w_event.shape, jnp.float32)
    layer.set_weights(w_user, w_event)
    out_user2, out_event2 = layer(A_user, A_event)
    jax.block_until_ready((out_user2, out_event2))
    ref_user2 = _reference(A_user, w_user)
    ref_event2 = _reference(A_event, w_event)
    assert jnp.allclose(out_user2, ref_user2, atol=1e-5, rtol=1e-5)
    assert jnp.allclose(out_event2, ref_event2, atol=1e-5, rtol=1e-5)

    print("KERNEL_OK")
</pallas_src>

<mosaic_0001>
module attributes {stable_mosaic.version = 11 : i64} {
  func.func @_kernel_uniform(%arg0: i32, %arg1: memref<2x4x128xf32, #tpu.memory_space<vmem>>, %arg2: memref<2x4x128xf32, #tpu.memory_space<vmem>>, %arg3: memref<4x128xf32, #tpu.memory_space<vmem>>, %arg4: memref<4x128xf32, #tpu.memory_space<vmem>>) attributes {dimension_semantics = [#tpu.dimension_semantics<parallel>], iteration_bounds = array<i64: 1>, scalar_prefetch = 0 : i64, scratch_operands = 0 : i64, tpu.core_type = #tpu.core_type<tc>, window_params = [{transform_indices = @transform_0, window_bounds = array<i64: 2, 4, 128>}, {transform_indices = @transform_1, window_bounds = array<i64: 2, 4, 128>}, {transform_indices = @transform_2, window_bounds = array<i64: 4, 128>}, {transform_indices = @transform_3, window_bounds = array<i64: 4, 128>}]} {
    %c0 = arith.constant 0 : index
    %c0_0 = arith.constant 0 : index
    %c0_1 = arith.constant 0 : index
    %0 = vector.load %arg1[%c0, %c0_0, %c0_1] : memref<2x4x128xf32, #tpu.memory_space<vmem>>, vector<1x4x128xf32>
    %1 = vector.shape_cast %0 : vector<1x4x128xf32> to vector<4x128xf32>
    %c0_2 = arith.constant 0 : index
    %c0_3 = arith.constant 0 : index
    %c0_4 = arith.constant 0 : index
    %2 = vector.load %arg2[%c0_2, %c0_3, %c0_4] : memref<2x4x128xf32, #tpu.memory_space<vmem>>, vector<1x4x128xf32>
    %3 = vector.shape_cast %2 : vector<1x4x128xf32> to vector<4x128xf32>
    %c1 = arith.constant 1 : index
    %c0_5 = arith.constant 0 : index
    %c0_6 = arith.constant 0 : index
    %4 = vector.load %arg1[%c1, %c0_5, %c0_6] : memref<2x4x128xf32, #tpu.memory_space<vmem>>, vector<1x4x128xf32>
    %5 = vector.shape_cast %4 : vector<1x4x128xf32> to vector<4x128xf32>
    %6 = arith.addf %1, %5 : vector<4x128xf32>
    %c1_7 = arith.constant 1 : index
    %c0_8 = arith.constant 0 : index
    %c0_9 = arith.constant 0 : index
    %7 = vector.load %arg2[%c1_7, %c0_8, %c0_9] : memref<2x4x128xf32, #tpu.memory_space<vmem>>, vector<1x4x128xf32>
    %8 = vector.shape_cast %7 : vector<1x4x128xf32> to vector<4x128xf32>
    %9 = arith.addf %3, %8 : vector<4x128xf32>
    %cst = arith.constant 5.000000e-01 : f32
    %10 = vector.broadcast %cst : f32 to vector<4x128xf32>
    %11 = arith.mulf %6, %10 : vector<4x128xf32>
    %c0_10 = arith.constant 0 : index
    %c0_11 = arith.constant 0 : index
    %12 = vector.load %arg3[%c0_10, %c0_11] : memref<4x128xf32, #tpu.memory_space<vmem>>, vector<4x128xf32>
    tpu.vector_store %arg3[%c0_10, %c0_11], %11 {strides = array<i32>} : memref<4x128xf32, #tpu.memory_space<vmem>>, vector<4x128xf32>,
    %cst_12 = arith.constant 5.000000e-01 : f32
    %13 = vector.broadcast %cst_12 : f32 to vector<4x128xf32>
    %14 = arith.mulf %9, %13 : vector<4x128xf32>
    %c0_13 = arith.constant 0 : index
    %c0_14 = arith.constant 0 : index
    %15 = vector.load %arg4[%c0_13, %c0_14] : memref<4x128xf32, #tpu.memory_space<vmem>>, vector<4x128xf32>
    tpu.vector_store %arg4[%c0_13, %c0_14], %14 {strides = array<i32>} : memref<4x128xf32, #tpu.memory_space<vmem>>, vector<4x128xf32>,
    return
  }
  func.func @transform_0(%arg0: i32) -> (i32, i32, i32) {
    %c0_i32 = arith.constant 0 : i32
    %c0_i32_0 = arith.constant 0 : i32
    %c0_i32_1 = arith.constant 0 : i32
    return %c0_i32, %arg0, %c0_i32_0 : i32, i32, i32
  }
  func.func @transform_1(%arg0: i32) -> (i32, i32, i32) {
    %c0_i32 = arith.constant 0 : i32
    %c0_i32_0 = arith.constant 0 : i32
    %c0_i32_1 = arith.constant 0 : i32
    return %c0_i32, %arg0, %c0_i32_0 : i32, i32, i32
  }
  func.func @transform_2(%arg0: i32) -> (i32, i32) {
    %c0_i32 = arith.constant 0 : i32
    %c0_i32_0 = arith.constant 0 : i32
    return %arg0, %c0_i32 : i32, i32
  }
  func.func @transform_3(%arg0: i32) -> (i32, i32) {
    %c0_i32 = arith.constant 0 : i32
    %c0_i32_0 = arith.constant 0 : i32
    return %arg0, %c0_i32 : i32, i32
  }
}

</mosaic_0001>

<bundles_post_ra>
// kernel: _forward_uniform.1
= control target key start
LH: loop header
LB: loop body
LE: loop exit
PB: predicated region body
PF: predicated region fallthrough
CT: control target
= control target key end

     0   :  { %s73_s0 = inlined_call_operand.vmem [shape: f32[2,4,128], index: 0, kind: input, shape index: {}]   ;;  %s74_s1 = inlined_call_operand.vmem [shape: f32[2,4,128], index: 1, kind: input, shape index: {}]   ;;  %s75_s2 = inlined_call_operand.vmem [shape: f32[4,128], index: 2, kind: output, shape index: {0}]   ;;  %s76_s3 = inlined_call_operand.vmem [shape: f32[4,128], index: 3, kind: output, shape index: {1}]  }
   0x1   :  { %v13_v0 = vld [vmem:[%s73_s0] sm:$0xf]  ;;  %v33_v1 = vld [vmem:[%s73_s0 + $0x4] sm:$0xf] }
   0x2   :  { %v14_v2 = vld [vmem:[%s74_s1] sm:$0xf]  ;;  %v17_v3 = vadd.f32 %v33_v1, %v13_v0  ;;  %v34_v4 = vld [vmem:[%s74_s1 + $0x4] sm:$0xf] }
   0x3   :  { %v20_v5 = vadd.f32 %v34_v4, %v14_v2 }
   0x4   :  { %v21_v6 = vmul.f32 0.5, %v17_v3 }
   0x5   :  { %v23_v7 = vmul.f32 0.5, %v20_v5 }
   0x6   :  { %22 = vst [vmem:[%s75_s2] sm:$0xf] %v21_v6 }
   0x7   :  { %24 = vst [vmem:[%s76_s3] sm:$0xf] %v23_v7 }

</bundles_post_ra>
